<compile_context>
chip_gen: v5e
topology: v5e:2x2
jax: 0.10.0
libtpu: 0.0.40
codegen_flags: <defaults>
</compile_context>

<pallas_src>
import jax
import jax.numpy as jnp
from jax.experimental import pallas as pl
from jax.experimental.pallas import tpu as pltpu


def _round_up(x: int, m: int) -> int:
    return ((x + m - 1) // m) * m


def _cdiv(a: int, b: int) -> int:
    return (a + b - 1) // b


def _vmem_capacity_bytes() -> int:
    """Physical per-core VMEM; conservative v7x default if query unavailable."""
    try:
        return int(pltpu.get_tpu_info().vmem_capacity_bytes)
    except Exception:
        return 64 << 20


def _resident_spec(shape):
    """Weights/biases: constant index_map -> VMEM-resident, never re-DMA'd.
    pl.Buffered(1) drops the pointless second pipeline buffer (halves the
    resident-weight VMEM footprint)."""
    index_map = lambda i: (0,) * len(shape)
    if hasattr(pl, "Buffered"):
        try:
            return pl.BlockSpec(shape, index_map, pipeline_mode=pl.Buffered(1))
        except TypeError:
            pass
    return pl.BlockSpec(shape, index_map)


def mlp_kernel(x_ref, w1_ref, b1_ref, w2_ref, b2_ref, o_ref):
    # Cast the streamed f32 x tile to the bf16 compute dtype in-VMEM (VPU work
    # hidden under the matmul) instead of a wrapper-side cast that would add a
    # full extra HBM pass over x.
    xb = x_ref[...].astype(w1_ref.dtype)
    # fc1: [tile_m, in_f] @ [in_f, hid_pad], f32 accumulation; bias + ReLU in f32.
    h = jnp.dot(xb, w1_ref[...], preferred_element_type=jnp.float32)
    h = jnp.maximum(h + b1_ref[...], 0.0)
    # fc2: [tile_m, hid_pad] @ [hid_pad, cls_pad], f32 accumulation.
    out = jnp.dot(h.astype(w2_ref.dtype), w2_ref[...],
                  preferred_element_type=jnp.float32)
    o_ref[...] = (out + b2_ref[...]).astype(o_ref.dtype)


def prepare_params(w1, b1, w2, b2, *, compute_dtype=jnp.bfloat16):
    """One-time (init-time) padding/casting of the parameters.

    w1: [in, hidden], b1: [hidden], w2: [hidden, classes], b2: [classes].
    Hidden / class lane dims are zero-padded to multiples of 128 (exact: extra
    columns produce zeros that are sliced off).  Weights are stored bf16;
    biases stay f32 and are added after the f32 MXU accumulation.
    """
    in_f, hidden = w1.shape
    num_classes = w2.shape[1]
    hid_pad = _round_up(hidden, 128)
    cls_pad = _round_up(num_classes, 128)
    w1p = jnp.pad(w1, ((0, 0), (0, hid_pad - hidden))).astype(compute_dtype)
    b1p = jnp.pad(b1, (0, hid_pad - hidden)).astype(jnp.float32).reshape(1, hid_pad)
    w2p = jnp.pad(w2, ((0, hid_pad - hidden),
                       (0, cls_pad - num_classes))).astype(compute_dtype)
    b2p = jnp.pad(b2, (0, cls_pad - num_classes)).astype(jnp.float32).reshape(1, cls_pad)
    return {"w1": w1p, "b1": b1p, "w2": w2p, "b2": b2p,
            "in_features": in_f, "hidden": hidden, "num_classes": num_classes}


def neural_network_forward(x, params, *, use_pallas=None, tile_m_cap=1024):
    """x: [B, in_features] float32; params from prepare_params().
    Returns [B, num_classes] float32 (fc2(relu(fc1(x))))."""
    B, in_f = x.shape
    assert in_f == params["in_features"]
    w1p, b1p, w2p, b2p = params["w1"], params["b1"], params["w2"], params["b2"]
    num_classes = params["num_classes"]
    hid_pad = w1p.shape[1]
    cls_pad = w2p.shape[1]

    if use_pallas is None:
        # Tiny/degenerate shapes: lane padding (e.g. 4 -> 128 classes) plus
        # launch overhead dominate; a fused XLA matmul is strictly faster.
        use_pallas = B * (in_f * hid_pad + hid_pad * cls_pad) >= (1 << 20)

    if not use_pallas:
        xb = x.astype(w1p.dtype)
        h = jnp.maximum(
            jnp.dot(xb, w1p, preferred_element_type=jnp.float32) + b1p, 0.0)
        out = jnp.dot(h.astype(w2p.dtype), w2p,
                      preferred_element_type=jnp.float32) + b2p
        return out[:, :num_classes].astype(x.dtype)

    cdt_size = jnp.dtype(w1p.dtype).itemsize      # 2 (bf16)
    x_size = jnp.dtype(x.dtype).itemsize          # 4 (f32)

    # --- VMEM working-set accounting (drives tile_m and vmem_limit_bytes) ---
    weight_bufs = 1 if hasattr(pl, "Buffered") else 2
    weights_bytes = weight_bufs * (in_f * hid_pad * cdt_size
                                   + hid_pad * cls_pad * cdt_size
                                   + hid_pad * 4 + cls_pad * 4)
    per_row_bytes = (2 * in_f * x_size             # x tile, double-buffered
                     + in_f * cdt_size             # in-kernel bf16 copy of x tile
                     + 2 * cls_pad * 4             # f32 output tile, double-buffered
                     + hid_pad * (4 + cdt_size))   # f32 h + bf16 copy fed to fc2
    vmem_cap = _vmem_capacity_bytes()
    budget = (vmem_cap * 3) // 4 - weights_bytes - (4 << 20)  # Mosaic scratch reserve
    tile_from_vmem = max(8, (budget // per_row_bytes) // 8 * 8)
    # TODO(synk): if `budget` goes negative (very large hidden), chunk fc1 over
    # hidden slabs inside the kernel instead of keeping full w1/w2/h resident.
    tile_m_cap = max(8, min(tile_m_cap, tile_from_vmem))

    # Balanced batch tiling: minimal padding (<= 7 rows) and >= 2 tiles when
    # possible so ("parallel",) actually shards across both v7x TensorCores.
    min_tiles = 2 if B >= 16 else 1
    num_tiles = max(_cdiv(B, tile_m_cap), min_tiles)
    tile_m = _round_up(_cdiv(B, num_tiles), 8)
    grid_m = _cdiv(B, tile_m)
    b_pad = grid_m * tile_m

    # x is never lane-padded; batch is padded only when tile_m doesn't divide B.
    x_in = x if b_pad == B else jnp.pad(x, ((0, b_pad - B), (0, 0)))

    needed = weights_bytes + tile_m * per_row_bytes
    vmem_limit = int(min(max(needed + (16 << 20), 32 << 20), (vmem_cap * 7) // 8))

    flops = 2 * b_pad * (in_f * hid_pad + hid_pad * cls_pad)
    bytes_accessed = (b_pad * in_f * x_size
                      + in_f * hid_pad * cdt_size + hid_pad * cls_pad * cdt_size
                      + (hid_pad + cls_pad) * 4
                      + b_pad * cls_pad * 4)

    out_padded = pl.pallas_call(
        mlp_kernel,
        out_shape=jax.ShapeDtypeStruct((b_pad, cls_pad), jnp.float32),
        grid_spec=pltpu.PrefetchScalarGridSpec(
            num_scalar_prefetch=0,
            grid=(grid_m,),
            in_specs=[
                # x tile: last dim == full in_features (no 128 padding needed).
                pl.BlockSpec((tile_m, in_f), lambda i: (i, 0)),
                _resident_spec((in_f, hid_pad)),
                _resident_spec((1, hid_pad)),
                _resident_spec((hid_pad, cls_pad)),
                _resident_spec((1, cls_pad)),
            ],
            # Lane-dense (multiple-of-128) output block -> unmasked vst.
            out_specs=pl.BlockSpec((tile_m, cls_pad), lambda i: (i, 0)),
        ),
        compiler_params=pltpu.CompilerParams(
            dimension_semantics=("parallel",),
            vmem_limit_bytes=vmem_limit,
        ),
        cost_estimate=pl.CostEstimate(
            flops=flops, transcendentals=0, bytes_accessed=bytes_accessed),
    )(x_in, w1p, b1p, w2p, b2p)

    return out_padded[:B, :num_classes].astype(x.dtype)


def init_params(key, input_size, hidden_size, num_classes):
    """PyTorch-style uniform(-1/sqrt(fan_in), 1/sqrt(fan_in)) init."""
    k1, k2, k3, k4 = jax.random.split(key, 4)
    bound1 = 1.0 / jnp.sqrt(jnp.float32(input_size))
    bound2 = 1.0 / jnp.sqrt(jnp.float32(hidden_size))
    w1 = jax.random.uniform(k1, (input_size, hidden_size), jnp.float32,
                            -bound1, bound1)
    b1 = jax.random.uniform(k2, (hidden_size,), jnp.float32, -bound1, bound1)
    w2 = jax.random.uniform(k3, (hidden_size, num_classes), jnp.float32,
                            -bound2, bound2)
    b2 = jax.random.uniform(k4, (num_classes,), jnp.float32, -bound2, bound2)
    return w1, b1, w2, b2


if __name__ == "__main__":
    # Small shapes consistent with the module's forward.
    batch, input_size, hidden_size, num_classes = 64, 16, 32, 4

    key = jax.random.PRNGKey(0)
    kx, kp = jax.random.split(key)
    x = jax.random.normal(kx, (batch, input_size), jnp.float32)
    w1, b1, w2, b2 = init_params(kp, input_size, hidden_size, num_classes)
    params = prepare_params(w1, b1, w2, b2)

    # Force the Pallas path so the kernel itself is exercised.
    out = neural_network_forward(x, params, use_pallas=True)
    out = jax.block_until_ready(out)
    assert out.shape == (batch, num_classes)

    # Reference with matching numerics (bf16 operands, f32 accumulation).
    xb = x.astype(jnp.bfloat16)
    h_ref = jnp.maximum(
        jnp.dot(xb, w1.astype(jnp.bfloat16),
                preferred_element_type=jnp.float32) + b1, 0.0)
    ref = jnp.dot(h_ref.astype(jnp.bfloat16), w2.astype(jnp.bfloat16),
                  preferred_element_type=jnp.float32) + b2
    assert jnp.allclose(out, ref, atol=1e-2, rtol=1e-2)

    # Loose check against the fp32 PyTorch-equivalent forward (bf16 rounding).
    ref32 = jnp.maximum(x @ w1 + b1, 0.0) @ w2 + b2
    assert jnp.allclose(out, ref32, atol=5e-2, rtol=5e-2)

    print("KERNEL_OK")
</pallas_src>

<mosaic_0001>
module attributes {stable_mosaic.version = 11 : i64} {
  func.func @mlp_kernel(%arg0: i32, %arg1: memref<32x16xf32, #tpu.memory_space<vmem>>, %arg2: memref<16x128xbf16, #tpu.memory_space<vmem>>, %arg3: memref<1x128xf32, #tpu.memory_space<vmem>>, %arg4: memref<128x128xbf16, #tpu.memory_space<vmem>>, %arg5: memref<1x128xf32, #tpu.memory_space<vmem>>, %arg6: memref<32x128xf32, #tpu.memory_space<vmem>>) attributes {dimension_semantics = [#tpu.dimension_semantics<parallel>], iteration_bounds = array<i64: 2>, scalar_prefetch = 0 : i64, scratch_operands = 0 : i64, tpu.core_type = #tpu.core_type<tc>, window_params = [{transform_indices = @transform_0, window_bounds = array<i64: 32, 16>}, {pipeline_mode = #tpu.pipeline_mode<synchronous>, transform_indices = @transform_1, window_bounds = array<i64: 16, 128>}, {pipeline_mode = #tpu.pipeline_mode<synchronous>, transform_indices = @transform_2, window_bounds = array<i64: 1, 128>}, {pipeline_mode = #tpu.pipeline_mode<synchronous>, transform_indices = @transform_3, window_bounds = array<i64: 128, 128>}, {pipeline_mode = #tpu.pipeline_mode<synchronous>, transform_indices = @transform_4, window_bounds = array<i64: 1, 128>}, {transform_indices = @transform_5, window_bounds = array<i64: 32, 128>}]} {
    %c0 = arith.constant 0 : index
    %c0_0 = arith.constant 0 : index
    %0 = vector.load %arg1[%c0, %c0_0] : memref<32x16xf32, #tpu.memory_space<vmem>>, vector<32x16xf32>
    %1 = arith.truncf %0 : vector<32x16xf32> to vector<32x16xbf16>
    %c0_1 = arith.constant 0 : index
    %c0_2 = arith.constant 0 : index
    %2 = vector.load %arg2[%c0_1, %c0_2] : memref<16x128xbf16, #tpu.memory_space<vmem>>, vector<16x128xbf16>
    %cst = arith.constant dense<0.000000e+00> : vector<32x128xf32>
    %3 = tpu.matmul %1, %2, %cst {dimension_numbers = #tpu.dot_dimension_numbers<[1], [0], [0], [1], [0, 0, 1, 1], [], []>} : vector<32x16xbf16>, vector<16x128xbf16>, vector<32x128xf32> -> vector<32x128xf32>
    %c0_3 = arith.constant 0 : index
    %c0_4 = arith.constant 0 : index
    %4 = vector.load %arg3[%c0_3, %c0_4] : memref<1x128xf32, #tpu.memory_space<vmem>>, vector<1x128xf32>
    %5 = vector.broadcast %4 : vector<1x128xf32> to vector<32x128xf32>
    %6 = arith.addf %3, %5 : vector<32x128xf32>
    %cst_5 = arith.constant 0.000000e+00 : f32
    %7 = vector.broadcast %cst_5 : f32 to vector<32x128xf32>
    %8 = arith.maximumf %6, %7 : vector<32x128xf32>
    %9 = arith.truncf %8 : vector<32x128xf32> to vector<32x128xbf16>
    %c0_6 = arith.constant 0 : index
    %c0_7 = arith.constant 0 : index
    %10 = vector.load %arg4[%c0_6, %c0_7] : memref<128x128xbf16, #tpu.memory_space<vmem>>, vector<128x128xbf16>
    %cst_8 = arith.constant dense<0.000000e+00> : vector<32x128xf32>
    %11 = tpu.matmul %9, %10, %cst_8 {dimension_numbers = #tpu.dot_dimension_numbers<[1], [0], [0], [1], [0, 0, 1, 1], [], []>} : vector<32x128xbf16>, vector<128x128xbf16>, vector<32x128xf32> -> vector<32x128xf32>
    %c0_9 = arith.constant 0 : index
    %c0_10 = arith.constant 0 : index
    %12 = vector.load %arg5[%c0_9, %c0_10] : memref<1x128xf32, #tpu.memory_space<vmem>>, vector<1x128xf32>
    %13 = vector.broadcast %12 : vector<1x128xf32> to vector<32x128xf32>
    %14 = arith.addf %11, %13 : vector<32x128xf32>
    %c0_11 = arith.constant 0 : index
    %c0_12 = arith.constant 0 : index
    %15 = vector.load %arg6[%c0_11, %c0_12] : memref<32x128xf32, #tpu.memory_space<vmem>>, vector<32x128xf32>
    tpu.vector_store %arg6[%c0_11, %c0_12], %14 {strides = array<i32>} : memref<32x128xf32, #tpu.memory_space<vmem>>, vector<32x128xf32>,
    return
  }
  func.func @transform_0(%arg0: i32) -> (i32, i32) {
    %c0_i32 = arith.constant 0 : i32
    %c0_i32_0 = arith.constant 0 : i32
    return %arg0, %c0_i32 : i32, i32
  }
  func.func @transform_1(%arg0: i32) -> (i32, i32) {
    %c0_i32 = arith.constant 0 : i32
    %c0_i32_0 = arith.constant 0 : i32
    %c0_i32_1 = arith.constant 0 : i32
    return %c0_i32, %c0_i32_0 : i32, i32
  }
  func.func @transform_2(%arg0: i32) -> (i32, i32) {
    %c0_i32 = arith.constant 0 : i32
    %c0_i32_0 = arith.constant 0 : i32
    %c0_i32_1 = arith.constant 0 : i32
    return %c0_i32, %c0_i32_0 : i32, i32
  }
  func.func @transform_3(%arg0: i32) -> (i32, i32) {
    %c0_i32 = arith.constant 0 : i32
    %c0_i32_0 = arith.constant 0 : i32
    %c0_i32_1 = arith.constant 0 : i32
    return %c0_i32, %c0_i32_0 : i32, i32
  }
  func.func @transform_4(%arg0: i32) -> (i32, i32) {
    %c0_i32 = arith.constant 0 : i32
    %c0_i32_0 = arith.constant 0 : i32
    %c0_i32_1 = arith.constant 0 : i32
    return %c0_i32, %c0_i32_0 : i32, i32
  }
  func.func @transform_5(%arg0: i32) -> (i32, i32) {
    %c0_i32 = arith.constant 0 : i32
    %c0_i32_0 = arith.constant 0 : i32
    return %arg0, %c0_i32 : i32, i32
  }
}

</mosaic_0001>

<bundles_post_ra>
// kernel: tpu_custom_call.1
= control target key start
LH: loop header
LB: loop body
LE: loop exit
PB: predicated region body
PF: predicated region fallthrough
CT: control target
= control target key end

     0   :  { %10 = vsyncpa [#allocation3], 0  ;;  %s770_s0 = inlined_call_operand.vmem [shape: f32[64,16], index: 0, kind: input, shape index: {}]   ;;  %s771_s1 = inlined_call_operand.vmem [shape: bf16[16,128], index: 1, kind: input, shape index: {}]   ;;  %s772_s2 = inlined_call_operand.vmem [shape: f32[1,128], index: 2, kind: input, shape index: {}]   ;;  %s773_s3 = inlined_call_operand.vmem [shape: bf16[128,128], index: 3, kind: input, shape index: {}]   ;;  %s774_s4 = inlined_call_operand.vmem [shape: f32[1,128], index: 4, kind: input, shape index: {}]   ;;  %s775_s5 = inlined_call_operand.hbm [shape: f32[64,128], index: 5, kind: output, shape index: {}]  }
   0x1   :  { %12 = vsyncpa [#allocation3 + $0x1], 0  ;;  %s653_s18 = smov 0   ;;  %s655_s19 = smov 0  }
   0x2   :  { %s657_s20 = smov 0   ;;  %s659_s21 = smov 0  }
   0x3 LB: > { %s674_s22 = sadd.s32 4294967295, %s619_s21   ;;  %s446_s23 = sadd.s32 4294967294, %s619_s21   ;;  %s619_s21 = sphi %s659_s21, %s781_s21   ;;  %s615_s20 = sphi %s657_s20, %s780_s20   ;;  %s611_s19 = sphi %s655_s19, %s779_s19   ;;  %s607_s18 = sphi %s653_s18, %s778_s18  }
   0x4   : > { %s678_s24 = sadd.s32 1, %s619_s21   ;;  %s135_s25 = sadd.s32 1, %s615_s20 }
   0x5   : > { %s132_s26 = ssub.s32 %s619_s21, %s678_s24  ;;  %p145_p0 = scmp.ne.s32.totalorder %s615_s20, %s611_s19 }
   0x6   : > { %p133_p1 = scmp.eq.s32.totalorder %s132_s26, 0  ;;  %p146_p2 = scmp.eq.s32.totalorder %s674_s22, 1 }
   0x7   : > { %p151_p3 = scmp.ne.s32.totalorder %s611_s19, %s607_s18  ;;  %p152_p4 = scmp.eq.s32.totalorder %s446_s23, 1 }
   0x8   : > { %s689_s27 = scalar_select %p133_p1, %s615_s20, %s135_s25  }
   0x9   : > { %p691_p5 = por %p146_p2, %p145_p0  ;;  %p695_p6 = por %p152_p4, %p151_p3 }
   0xa   : > { %p449_p7 = scmp.ge.s32.totalorder %s619_s21, 1  ;;  %p191_p8 = scmp.lt.s32.totalorder %s619_s21, 3 }
   0xc   : > { %p192_p9 = pnand %p449_p7, %p191_p8 }
   0xd   : > { %s451_s7 = sshll.u32 (!%p192_p9), %s674_s22, 2  ;;  %s216_s14 = sand.u32 (!%p192_p9), 1, %s611_s19  }
   0xe   : > { %195 = sbr.rel (%p192_p9) target bundleno = 327 (0x147), region = 40  ;;  %p220_p10 = scmp.lt.s32.totalorder (!%p192_p9), %s451_s7, 7 }
   0xf   : > { %s505_s25 = sshll.u32 (!%p192_p9), %s674_s22, 5  ;;  %s369_s9 = scalar_lea.sflag (!%p192_p9), [#allocation3], %s216_s14 }
  0x10   : > { %s380_s6 = scalar_lea.hbm (!%p192_p9), %s775_s5, %s505_s25  ;;  %s577_s13 = scalar_lea.hbm (!%p192_p9), %s775_s5, 64 }
  0x11   : > { %s383_s8 = sshll.u32 (!%p192_p9), %s380_s6, 4  ;;  %s384_s8 = int_to_ptr.hbm [resolvable:$true] %s383_s8 }
  0x12   : > { %s571_s10 = sshra.s32 (!%p192_p9), %s384_s8, 4  ;;  %s572_s10 = int_to_ptr.hbm [resolvable:$true] %s571_s10 }
  0x13   : > { %v496_v0 = vld [vmem:[%s771_s1] sm:$0xff]  ;;  %v504_v1 = vld [vmem:[%s773_s3 + $0x38] sm:$0xff]  ;;  %v503_v2 = vld [vmem:[%s773_s3 + $0x30] sm:$0xff]  ;;  %s783_s7 = smov (!%p220_p10, %s451_s7), 7  ;;  %vm245_vm0 = vcmask 130048   ;;  %s573_s11 = scalar_lea.hbm %s572_s10, 32 }
  0x14   : > { %259 = vmatpush.bf16.msra.mxu0 %v496_v0  ;;  %345 = vmatpush.bf16.msra.mxu1 %v504_v1  ;;  %s452_s12 = sshll.u32 %s783_s7, 3  ;;  %v502_v3 = vld [vmem:[%s773_s3 + $0x28] sm:$0xff]  ;;  %v501_v7 = vld [vmem:[%s773_s3 + $0x20] sm:$0xff]  ;;  %v500_v11 = vld [vmem:[%s773_s3 + $0x18] sm:$0xff]  ;;  %p574_p11 = scmp.ne.s32.totalorder %s572_s10, %s573_s11 }
  0x15   : > { %506 = vmatpush.bf16.msra.mxu2 %v504_v1  ;;  %s223_s15 = scalar_lea.vmem %s770_s0, %s452_s12  ;;  %v499_v12 = vld [vmem:[%s773_s3 + $0x10] sm:$0xff]  ;;  %v498_v13 = vld [vmem:[%s773_s3 + $0x8] sm:$0xff]  ;;  %v497_v14 = vld [vmem:[%s773_s3] sm:$0xff]  ;;  %p578_p0 = scmp.lt.s32.totalorder %s572_s10, %s775_s5 }
  0x16   : > { %v227_v4 = vld [vmem:[%s223_s15] sm:$0xff]  ;;  %v228_v5 = vld [vmem:[%s223_s15 + $0x8] sm:$0xff]  ;;  %v229_v8 = vld [vmem:[%s223_s15 + $0x10] sm:$0xff]  ;;  %p575_p12 = pnand %p574_p11, %p691_p5  ;;  %p579_p1 = scmp.lt.s32.totalorder %s577_s13, %s573_s11 }
  0x17   : > { %v231_v6 = vpack.c.bf16 %v228_v5, %v227_v4  ;;  %v230_v9 = vld [vmem:[%s223_s15 + $0x18] sm:$0xff]  ;;  %v555_v16 = vld [vmem:[%s772_s2] ss:$0 sm:$0xff]  ;;  %s450_s15 = sshll.u32 %s216_s14, 5 }
  0x18   : > { %346 = vmatpush.bf16.msra.mxu1 %v503_v2  ;;  %v232_v10 = vpack.c.bf16 %v230_v9, %v229_v8  ;;  %v556_v30 = vld [vmem:[%s774_s4] ss:$0 sm:$0xff]  ;;  %s218_s23 = scalar_lea.vmem [#allocation2], %s450_s15  ;;  %p576_p13 = pneg %p575_p12 }
  0x19   : > { %507 = vmatpush.bf16.msra.mxu2 %v503_v2  ;;  %457 = vmatmul.msk.bf16.vlgmr.msra.gmra.mxu0 %vm245_vm0, %v231_v6  ;;  %s381_s7 = sshll.u32 %s218_s23, 4  ;;  %p580_p2 = por %p579_p1, %p578_p0  ;;  %s382_s7 = int_to_ptr.vmem [resolvable:$true] %s381_s7 }
  0x1b   : > { %p581_p3 = pnand %p580_p2, %p576_p13 }
  0x1c   : > { %347 = vmatpush.bf16.msra.mxu1 %v502_v3 }
  0x1d   : > { %508 = vmatpush.bf16.msra.mxu2 %v502_v3 }
  0x20   : > { %348 = vmatpush.bf16.msra.mxu1 %v501_v7 }
  0x21   : > { %509 = vmatpush.bf16.msra.mxu2 %v501_v7 }
  0x24   : > { %349 = vmatpush.bf16.msra.mxu1 %v500_v11 }
  0x25   : > { %510 = vmatpush.bf16.msra.mxu2 %v500_v11 }
  0x28   : > { %350 = vmatpush.bf16.msra.mxu1 %v499_v12 }
  0x29   : > { %458 = vmatmul.msk.bf16.gmra.mxu0 %vm245_vm0, %v232_v10  ;;  %511 = vmatpush.bf16.msra.mxu2 %v499_v12 }
  0x2c   : > { %351 = vmatpush.bf16.msra.mxu1 %v498_v13 }
  0x2d   : > { %512 = vmatpush.bf16.msra.mxu2 %v498_v13 }
  0x30   : > { %352 = vmatpush.bf16.msra.mxu1 %v497_v14 }
  0x31   : > { %513 = vmatpush.bf16.msra.mxu2 %v497_v14 }
  0x96   : > { %v261_v15 = vpop.f32.mrf.mxu0 }
  0x97   : > { %v262_v17 = vadd.f32 %v555_v16, %v261_v15 }
  0x99   : > { %v271_v20 = vmax.f32 %v262_v17, 0.0 }
  0x9e   : > { %v263_v18 = vpop.f32.mrf.mxu0 }
  0x9f   : > { %v264_v19 = vadd.f32 %v555_v16, %v263_v18 }
  0xa1   : > { %v272_v21 = vmax.f32 %v264_v19, 0.0 }
  0xa3   : > { %v275_v22 = vpack.c.bf16 %v272_v21, %v271_v20 }
  0xa5   : > { %353 = vmatmul.bf16.vlgmr.msra.gmra.mxu1 %v275_v22 }
  0xa6   : > { %v266_v23 = vpop.f32.mrf.mxu0 }
  0xa7   : > { %v267_v24 = vadd.f32 %v555_v16, %v266_v23 }
  0xa9   : > { %v273_v27 = vmax.f32 %v267_v24, 0.0 }
  0xae   : > { %v268_v25 = vpop.f32.mrf.mxu0 }
  0xaf   : > { %v269_v26 = vadd.f32 %v555_v16, %v268_v25 }
  0xb1   : > { %v274_v28 = vmax.f32 %v269_v26, 0.0 }
  0xb3   : > { %v276_v29 = vpack.c.bf16 %v274_v28, %v273_v27 }
  0xb5   : > { %358 = vmatmul.bf16.vlgmr.msra.gmra.mxu2 %v276_v29 }
 0x122   : > { %v354_v31 = vpop.f32.mrf.mxu1 }
 0x123   : > { %v355_v32 = vadd.f32 %v556_v30, %v354_v31 }
 0x125   : > { %364 = vst [vmem:[%s218_s23] sm:$0xff] %v355_v32 }
 0x12a   : > { %v356_v33 = vpop.f32.mrf.mxu1 }
 0x12b   : > { %v357_v34 = vadd.f32 %v556_v30, %v356_v33 }
 0x12d   : > { %365 = vst [vmem:[%s218_s23 + $0x8] sm:$0xff] %v357_v34 }
 0x138   : > { %v359_v35 = vpop.f32.mrf.mxu2 }
 0x139   : > { %v360_v36 = vadd.f32 %v556_v30, %v359_v35 }
 0x13b   : > { %366 = vst [vmem:[%s218_s23 + $0x10] sm:$0xff] %v360_v36 }
 0x140   : > { %v361_v37 = vpop.f32.mrf.mxu2 }
 0x141   : > { %v362_v38 = vadd.f32 %v556_v30, %v361_v37 }
 0x143   : > { %367 = vst [vmem:[%s218_s23 + $0x18] sm:$0xff] %v362_v38 }
 0x144   : > { %584 = shalt.err (!%p581_p3)
}
 0x145   : > { %s621_s14 = smov 128   ;;  %s622_s17 = smov 8  }
 0x146   : > { %514 = dma.vmem_to_hbm [thread:$0]  (%p691_p5), %s382_s7, 512, %s384_s8, %s369_s9, %s621_s14, %s621_s14, %s622_s17  }
 0x147 PF: > { %p520_p4 = scmp.ge.s32.totalorder %s619_s21, 2  ;;  %s398_s23 = sand.u32 1, %s607_s18  }
 0x148   : > { %s399_s25 = scalar_lea.sflag [#allocation3], %s398_s23 }
 0x149   : > { %p517_p7 = pnand %p520_p4, %p695_p6 }
 0x14b   : > { %p518_p8 = pneg %p517_p7 }
 0x14d   : > { %602 = dma.done.wait (%p518_p8), %s399_s25, 512  }
 0x14e   : > { %604 = vsyncadd (%p518_p8), %s399_s25, 4294966784  ;;  %p15_p9 = scmp.ge.s32.totalorder %s678_s24, 4   ;;  %s778_s18 = smov %s611_s19 }
 0x14f   : > { %s779_s19 = smov %s615_s20  ;;  %s780_s20 = smov %s689_s27 }
 0x150   : > { %s781_s21 = smov %s678_s24  ;;  %17 = sbr.rel (!%p15_p9) target bundleno = 3 (0x3), region = 75 }
 0x155   :  { %405 = vsyncpa [#allocation3], 1 }
 0x156   :  { %407 = vsyncpa [#allocation3 + $0x1], 1 }

</bundles_post_ra>
